<compile_context>
chip_gen: v6e
topology: v6e:2x2x1
jax: 0.10.0
libtpu: 0.0.40
codegen_flags: <defaults>
</compile_context>

<pallas_src>
import jax
import jax.numpy as jnp
from jax.experimental import pallas as pl
from jax.experimental.pallas import tpu as pltpu

BN_EPS = 1e-5
HIDDEN_DIMS = (128, 64, 32, 16)
LANES = 128
LATENT_DIM = 16


def _encoder_kernel(x_ref, w_ref, aux_ref, out_ref):
    in_dim = x_ref.shape[1]
    h = x_ref[...]                                   # (B, in_dim) f32

    row, k = 0, in_dim
    for layer in range(4):
        # Linear (bias omitted: it cancels under batch-stat BatchNorm)
        y = jnp.dot(h, w_ref[row:row + k, :],        # (B, 128), zero-padded lanes
                    preferred_element_type=jnp.float32)
        # BatchNorm1d, training mode (batch mean, biased variance), folded to FMA
        mu = jnp.mean(y, axis=0, keepdims=True)
        d = y - mu
        var = jnp.mean(d * d, axis=0, keepdims=True)
        inv = jax.lax.rsqrt(var + BN_EPS)
        scale = aux_ref[layer:layer + 1, :] * inv            # gamma * inv (pad lanes -> 0)
        shift = aux_ref[4 + layer:5 + layer, :] - mu * scale  # beta - mu*scale
        h = jnp.maximum(y * scale + shift, 0.0)               # BN + ReLU
        row, k = row + k, LANES

    # Combined lane-dense output: lanes 0..15 = latent (h), lanes 16..16+C = classifier.
    # w_out has wc in rows 0..15 / cols 16..16+C and zeros elsewhere; h is zero on
    # lanes >= 16, so a single add merges the two without any partial store.
    out_ref[...] = (
        h
        + jnp.dot(h, w_ref[row:row + LANES, :], preferred_element_type=jnp.float32)
        + aux_ref[8:9, :]
    )


def pack_params(params, class_num):
    """Pack all weights into one (in_dim + 4*128, 128) slab and all small vectors
    (BN gamma/beta + classifier bias) into one (16, 128) aux slab."""
    def pad_to(a, rows, cols):
        return jnp.pad(a, ((0, rows - a.shape[0]), (0, cols - a.shape[1])))

    w_blocks = [params["w1"]]                          # (in_dim, 128)
    w_blocks.append(pad_to(params["w2"], LANES, LANES))
    w_blocks.append(pad_to(params["w3"], LANES, LANES))
    w_blocks.append(pad_to(params["w4"], LANES, LANES))
    # classifier projection placed in lanes 16..16+class_num of the output
    w_out = jnp.zeros((LANES, LANES), jnp.float32)
    w_out = w_out.at[:LATENT_DIM, LATENT_DIM:LATENT_DIM + class_num].set(params["wc"])
    w_blocks.append(w_out)
    w_slab = jnp.concatenate(w_blocks, axis=0)         # (in_dim + 512, 128)

    aux = jnp.zeros((16, LANES), jnp.float32)
    for i, d in enumerate(HIDDEN_DIMS):
        aux = aux.at[i, :d].set(params[f"g{i + 1}"][0])          # rows 0..3: gamma
        aux = aux.at[4 + i, :d].set(params[f"be{i + 1}"][0])     # rows 4..7: beta
    aux = aux.at[8, LATENT_DIM:LATENT_DIM + class_num].set(params["bc"][0])  # row 8: cls bias
    return w_slab, aux


def encoder_forward(x, w_slab, aux, class_num):
    """x: (B, paramF*paramM) f32. Returns (latent (B,16), cls_output (B,classNum))."""
    B = x.shape[0]
    vmem = pl.BlockSpec(memory_space=pltpu.MemorySpace.VMEM)
    out = pl.pallas_call(
        _encoder_kernel,
        out_shape=jax.ShapeDtypeStruct((B, LANES), jnp.float32),
        in_specs=[vmem, vmem, vmem],
        out_specs=vmem,
    )(x, w_slab, aux)
    latent = out[:, :LATENT_DIM]
    cls_out = out[:, LATENT_DIM:LATENT_DIM + class_num]
    return latent, cls_out


def init_params(key, param_f, param_m, class_num):
    """PyTorch-default Linear init (uniform +-1/sqrt(fan_in)); BN gamma=1, beta=0.
    b1..b4 are created only for the faithful reference (they cancel under BN)."""
    dims = [param_f * param_m, 128, 64, 32, 16]
    params = {}
    keys = jax.random.split(key, 2 * (len(dims) - 1) + 2)
    ki = 0
    for li in range(len(dims) - 1):
        fan_in, fan_out = dims[li], dims[li + 1]
        bound = 1.0 / (fan_in ** 0.5)
        params[f"w{li + 1}"] = jax.random.uniform(
            keys[ki], (fan_in, fan_out), jnp.float32, -bound, bound); ki += 1
        params[f"b{li + 1}"] = jax.random.uniform(
            keys[ki], (1, fan_out), jnp.float32, -bound, bound); ki += 1
        params[f"g{li + 1}"] = jnp.ones((1, fan_out), jnp.float32)
        params[f"be{li + 1}"] = jnp.zeros((1, fan_out), jnp.float32)
    bound = 1.0 / (16 ** 0.5)
    params["wc"] = jax.random.uniform(
        keys[ki], (16, class_num), jnp.float32, -bound, bound); ki += 1
    params["bc"] = jax.random.uniform(
        keys[ki], (1, class_num), jnp.float32, -bound, bound); ki += 1
    return params


def _reference_forward(x, params):
    """Pure-JAX reference matching PyTorch training-mode forward (biases included)."""
    h = x
    for li in range(1, 5):
        y = h @ params[f"w{li}"] + params[f"b{li}"]
        mu = jnp.mean(y, axis=0, keepdims=True)
        var = jnp.mean((y - mu) ** 2, axis=0, keepdims=True)
        y = (y - mu) / jnp.sqrt(var + BN_EPS)
        y = y * params[f"g{li}"] + params[f"be{li}"]
        h = jnp.maximum(y, 0.0)
    return h, h @ params["wc"] + params["bc"]


if __name__ == "__main__":
    param_f, param_m, class_num = 4, 8, 5   # input dim = 32
    batch = 8

    key = jax.random.PRNGKey(0)
    k_x, k_p = jax.random.split(key)
    x = jax.random.normal(k_x, (batch, param_f * param_m), jnp.float32)
    params = init_params(k_p, param_f, param_m, class_num)
    w_slab, aux = pack_params(params, class_num)   # done once, reused every call

    latent, cls_out = encoder_forward(x, w_slab, aux, class_num)
    latent = jax.block_until_ready(latent)
    cls_out = jax.block_until_ready(cls_out)

    ref_latent, ref_cls = _reference_forward(x, params)
    assert latent.shape == (batch, 16)
    assert cls_out.shape == (batch, class_num)
    assert jnp.allclose(latent, ref_latent, atol=1e-4, rtol=1e-4)
    assert jnp.allclose(cls_out, ref_cls, atol=1e-4, rtol=1e-4)

    print("KERNEL_OK")
</pallas_src>

<mosaic_0001>
module attributes {stable_mosaic.version = 11 : i64} {
  func.func @_encoder_kernel(%arg0: memref<8x32xf32, #tpu.memory_space<vmem>>, %arg1: memref<544x128xf32, #tpu.memory_space<vmem>>, %arg2: memref<16x128xf32, #tpu.memory_space<vmem>>, %arg3: memref<8x128xf32, #tpu.memory_space<vmem>>) attributes {dimension_semantics = [], scalar_prefetch = 0 : i64, scratch_operands = 0 : i64, tpu.core_type = #tpu.core_type<tc>} {
    %c0 = arith.constant 0 : index
    %c0_0 = arith.constant 0 : index
    %0 = vector.load %arg0[%c0, %c0_0] : memref<8x32xf32, #tpu.memory_space<vmem>>, vector<8x32xf32>
    %c0_1 = arith.constant 0 : index
    %c0_2 = arith.constant 0 : index
    %1 = vector.load %arg1[%c0_1, %c0_2] : memref<544x128xf32, #tpu.memory_space<vmem>>, vector<32x128xf32>
    %cst = arith.constant dense<0.000000e+00> : vector<8x128xf32>
    %2 = tpu.matmul %0, %1, %cst {dimension_numbers = #tpu.dot_dimension_numbers<[1], [0], [0], [1], [0, 0, 1, 1], [], []>} : vector<8x32xf32>, vector<32x128xf32>, vector<8x128xf32> -> vector<8x128xf32>
    %cst_3 = arith.constant dense<0.000000e+00> : vector<128xf32>
    %3 = vector.multi_reduction <add>, %2, %cst_3 [0] : vector<8x128xf32> to vector<128xf32>
    %4 = vector.shape_cast %3 : vector<128xf32> to vector<1x128xf32>
    %cst_4 = arith.constant 8.000000e+00 : f32
    %5 = vector.broadcast %cst_4 : f32 to vector<1x128xf32>
    %6 = arith.divf %4, %5 : vector<1x128xf32>
    %7 = vector.broadcast %6 : vector<1x128xf32> to vector<8x128xf32>
    %8 = arith.subf %2, %7 : vector<8x128xf32>
    %9 = arith.mulf %8, %8 : vector<8x128xf32>
    %cst_5 = arith.constant dense<0.000000e+00> : vector<128xf32>
    %10 = vector.multi_reduction <add>, %9, %cst_5 [0] : vector<8x128xf32> to vector<128xf32>
    %11 = vector.shape_cast %10 : vector<128xf32> to vector<1x128xf32>
    %cst_6 = arith.constant 8.000000e+00 : f32
    %12 = vector.broadcast %cst_6 : f32 to vector<1x128xf32>
    %13 = arith.divf %11, %12 : vector<1x128xf32>
    %cst_7 = arith.constant 9.99999974E-6 : f32
    %14 = vector.broadcast %cst_7 : f32 to vector<1x128xf32>
    %15 = arith.addf %13, %14 : vector<1x128xf32>
    %16 = math.rsqrt %15 : vector<1x128xf32>
    %c0_8 = arith.constant 0 : index
    %c0_9 = arith.constant 0 : index
    %17 = vector.load %arg2[%c0_8, %c0_9] : memref<16x128xf32, #tpu.memory_space<vmem>>, vector<1x128xf32>
    %18 = arith.mulf %17, %16 : vector<1x128xf32>
    %c4 = arith.constant 4 : index
    %c0_10 = arith.constant 0 : index
    %19 = vector.load %arg2[%c4, %c0_10] : memref<16x128xf32, #tpu.memory_space<vmem>>, vector<1x128xf32>
    %20 = arith.mulf %6, %18 : vector<1x128xf32>
    %21 = arith.subf %19, %20 : vector<1x128xf32>
    %22 = vector.broadcast %18 : vector<1x128xf32> to vector<8x128xf32>
    %23 = arith.mulf %2, %22 : vector<8x128xf32>
    %24 = vector.broadcast %21 : vector<1x128xf32> to vector<8x128xf32>
    %25 = arith.addf %23, %24 : vector<8x128xf32>
    %cst_11 = arith.constant 0.000000e+00 : f32
    %26 = vector.broadcast %cst_11 : f32 to vector<8x128xf32>
    %27 = arith.maximumf %25, %26 : vector<8x128xf32>
    %c32 = arith.constant 32 : index
    %c0_12 = arith.constant 0 : index
    %28 = vector.load %arg1[%c32, %c0_12] : memref<544x128xf32, #tpu.memory_space<vmem>>, vector<128x128xf32>
    %cst_13 = arith.constant dense<0.000000e+00> : vector<8x128xf32>
    %29 = tpu.matmul %27, %28, %cst_13 {dimension_numbers = #tpu.dot_dimension_numbers<[1], [0], [0], [1], [0, 0, 1, 1], [], []>} : vector<8x128xf32>, vector<128x128xf32>, vector<8x128xf32> -> vector<8x128xf32>
    %cst_14 = arith.constant dense<0.000000e+00> : vector<128xf32>
    %30 = vector.multi_reduction <add>, %29, %cst_14 [0] : vector<8x128xf32> to vector<128xf32>
    %31 = vector.shape_cast %30 : vector<128xf32> to vector<1x128xf32>
    %cst_15 = arith.constant 8.000000e+00 : f32
    %32 = vector.broadcast %cst_15 : f32 to vector<1x128xf32>
    %33 = arith.divf %31, %32 : vector<1x128xf32>
    %34 = vector.broadcast %33 : vector<1x128xf32> to vector<8x128xf32>
    %35 = arith.subf %29, %34 : vector<8x128xf32>
    %36 = arith.mulf %35, %35 : vector<8x128xf32>
    %cst_16 = arith.constant dense<0.000000e+00> : vector<128xf32>
    %37 = vector.multi_reduction <add>, %36, %cst_16 [0] : vector<8x128xf32> to vector<128xf32>
    %38 = vector.shape_cast %37 : vector<128xf32> to vector<1x128xf32>
    %cst_17 = arith.constant 8.000000e+00 : f32
    %39 = vector.broadcast %cst_17 : f32 to vector<1x128xf32>
    %40 = arith.divf %38, %39 : vector<1x128xf32>
    %cst_18 = arith.constant 9.99999974E-6 : f32
    %41 = vector.broadcast %cst_18 : f32 to vector<1x128xf32>
    %42 = arith.addf %40, %41 : vector<1x128xf32>
    %43 = math.rsqrt %42 : vector<1x128xf32>
    %c1 = arith.constant 1 : index
    %c0_19 = arith.constant 0 : index
    %44 = vector.load %arg2[%c1, %c0_19] : memref<16x128xf32, #tpu.memory_space<vmem>>, vector<1x128xf32>
    %45 = arith.mulf %44, %43 : vector<1x128xf32>
    %c5 = arith.constant 5 : index
    %c0_20 = arith.constant 0 : index
    %46 = vector.load %arg2[%c5, %c0_20] : memref<16x128xf32, #tpu.memory_space<vmem>>, vector<1x128xf32>
    %47 = arith.mulf %33, %45 : vector<1x128xf32>
    %48 = arith.subf %46, %47 : vector<1x128xf32>
    %49 = vector.broadcast %45 : vector<1x128xf32> to vector<8x128xf32>
    %50 = arith.mulf %29, %49 : vector<8x128xf32>
    %51 = vector.broadcast %48 : vector<1x128xf32> to vector<8x128xf32>
    %52 = arith.addf %50, %51 : vector<8x128xf32>
    %cst_21 = arith.constant 0.000000e+00 : f32
    %53 = vector.broadcast %cst_21 : f32 to vector<8x128xf32>
    %54 = arith.maximumf %52, %53 : vector<8x128xf32>
    %c160 = arith.constant 160 : index
    %c0_22 = arith.constant 0 : index
    %55 = vector.load %arg1[%c160, %c0_22] : memref<544x128xf32, #tpu.memory_space<vmem>>, vector<128x128xf32>
    %cst_23 = arith.constant dense<0.000000e+00> : vector<8x128xf32>
    %56 = tpu.matmul %54, %55, %cst_23 {dimension_numbers = #tpu.dot_dimension_numbers<[1], [0], [0], [1], [0, 0, 1, 1], [], []>} : vector<8x128xf32>, vector<128x128xf32>, vector<8x128xf32> -> vector<8x128xf32>
    %cst_24 = arith.constant dense<0.000000e+00> : vector<128xf32>
    %57 = vector.multi_reduction <add>, %56, %cst_24 [0] : vector<8x128xf32> to vector<128xf32>
    %58 = vector.shape_cast %57 : vector<128xf32> to vector<1x128xf32>
    %cst_25 = arith.constant 8.000000e+00 : f32
    %59 = vector.broadcast %cst_25 : f32 to vector<1x128xf32>
    %60 = arith.divf %58, %59 : vector<1x128xf32>
    %61 = vector.broadcast %60 : vector<1x128xf32> to vector<8x128xf32>
    %62 = arith.subf %56, %61 : vector<8x128xf32>
    %63 = arith.mulf %62, %62 : vector<8x128xf32>
    %cst_26 = arith.constant dense<0.000000e+00> : vector<128xf32>
    %64 = vector.multi_reduction <add>, %63, %cst_26 [0] : vector<8x128xf32> to vector<128xf32>
    %65 = vector.shape_cast %64 : vector<128xf32> to vector<1x128xf32>
    %cst_27 = arith.constant 8.000000e+00 : f32
    %66 = vector.broadcast %cst_27 : f32 to vector<1x128xf32>
    %67 = arith.divf %65, %66 : vector<1x128xf32>
    %cst_28 = arith.constant 9.99999974E-6 : f32
    %68 = vector.broadcast %cst_28 : f32 to vector<1x128xf32>
    %69 = arith.addf %67, %68 : vector<1x128xf32>
    %70 = math.rsqrt %69 : vector<1x128xf32>
    %c2 = arith.constant 2 : index
    %c0_29 = arith.constant 0 : index
    %71 = vector.load %arg2[%c2, %c0_29] : memref<16x128xf32, #tpu.memory_space<vmem>>, vector<1x128xf32>
    %72 = arith.mulf %71, %70 : vector<1x128xf32>
    %c6 = arith.constant 6 : index
    %c0_30 = arith.constant 0 : index
    %73 = vector.load %arg2[%c6, %c0_30] : memref<16x128xf32, #tpu.memory_space<vmem>>, vector<1x128xf32>
    %74 = arith.mulf %60, %72 : vector<1x128xf32>
    %75 = arith.subf %73, %74 : vector<1x128xf32>
    %76 = vector.broadcast %72 : vector<1x128xf32> to vector<8x128xf32>
    %77 = arith.mulf %56, %76 : vector<8x128xf32>
    %78 = vector.broadcast %75 : vector<1x128xf32> to vector<8x128xf32>
    %79 = arith.addf %77, %78 : vector<8x128xf32>
    %cst_31 = arith.constant 0.000000e+00 : f32
    %80 = vector.broadcast %cst_31 : f32 to vector<8x128xf32>
    %81 = arith.maximumf %79, %80 : vector<8x128xf32>
    %c288 = arith.constant 288 : index
    %c0_32 = arith.constant 0 : index
    %82 = vector.load %arg1[%c288, %c0_32] : memref<544x128xf32, #tpu.memory_space<vmem>>, vector<128x128xf32>
    %cst_33 = arith.constant dense<0.000000e+00> : vector<8x128xf32>
    %83 = tpu.matmul %81, %82, %cst_33 {dimension_numbers = #tpu.dot_dimension_numbers<[1], [0], [0], [1], [0, 0, 1, 1], [], []>} : vector<8x128xf32>, vector<128x128xf32>, vector<8x128xf32> -> vector<8x128xf32>
    %cst_34 = arith.constant dense<0.000000e+00> : vector<128xf32>
    %84 = vector.multi_reduction <add>, %83, %cst_34 [0] : vector<8x128xf32> to vector<128xf32>
    %85 = vector.shape_cast %84 : vector<128xf32> to vector<1x128xf32>
    %cst_35 = arith.constant 8.000000e+00 : f32
    %86 = vector.broadcast %cst_35 : f32 to vector<1x128xf32>
    %87 = arith.divf %85, %86 : vector<1x128xf32>
    %88 = vector.broadcast %87 : vector<1x128xf32> to vector<8x128xf32>
    %89 = arith.subf %83, %88 : vector<8x128xf32>
    %90 = arith.mulf %89, %89 : vector<8x128xf32>
    %cst_36 = arith.constant dense<0.000000e+00> : vector<128xf32>
    %91 = vector.multi_reduction <add>, %90, %cst_36 [0] : vector<8x128xf32> to vector<128xf32>
    %92 = vector.shape_cast %91 : vector<128xf32> to vector<1x128xf32>
    %cst_37 = arith.constant 8.000000e+00 : f32
    %93 = vector.broadcast %cst_37 : f32 to vector<1x128xf32>
    %94 = arith.divf %92, %93 : vector<1x128xf32>
    %cst_38 = arith.constant 9.99999974E-6 : f32
    %95 = vector.broadcast %cst_38 : f32 to vector<1x128xf32>
    %96 = arith.addf %94, %95 : vector<1x128xf32>
    %97 = math.rsqrt %96 : vector<1x128xf32>
    %c3 = arith.constant 3 : index
    %c0_39 = arith.constant 0 : index
    %98 = vector.load %arg2[%c3, %c0_39] : memref<16x128xf32, #tpu.memory_space<vmem>>, vector<1x128xf32>
    %99 = arith.mulf %98, %97 : vector<1x128xf32>
    %c7 = arith.constant 7 : index
    %c0_40 = arith.constant 0 : index
    %100 = vector.load %arg2[%c7, %c0_40] : memref<16x128xf32, #tpu.memory_space<vmem>>, vector<1x128xf32>
    %101 = arith.mulf %87, %99 : vector<1x128xf32>
    %102 = arith.subf %100, %101 : vector<1x128xf32>
    %103 = vector.broadcast %99 : vector<1x128xf32> to vector<8x128xf32>
    %104 = arith.mulf %83, %103 : vector<8x128xf32>
    %105 = vector.broadcast %102 : vector<1x128xf32> to vector<8x128xf32>
    %106 = arith.addf %104, %105 : vector<8x128xf32>
    %cst_41 = arith.constant 0.000000e+00 : f32
    %107 = vector.broadcast %cst_41 : f32 to vector<8x128xf32>
    %108 = arith.maximumf %106, %107 : vector<8x128xf32>
    %c416 = arith.constant 416 : index
    %c0_42 = arith.constant 0 : index
    %109 = vector.load %arg1[%c416, %c0_42] : memref<544x128xf32, #tpu.memory_space<vmem>>, vector<128x128xf32>
    %cst_43 = arith.constant dense<0.000000e+00> : vector<8x128xf32>
    %110 = tpu.matmul %108, %109, %cst_43 {dimension_numbers = #tpu.dot_dimension_numbers<[1], [0], [0], [1], [0, 0, 1, 1], [], []>} : vector<8x128xf32>, vector<128x128xf32>, vector<8x128xf32> -> vector<8x128xf32>
    %111 = arith.addf %108, %110 : vector<8x128xf32>
    %c8 = arith.constant 8 : index
    %c0_44 = arith.constant 0 : index
    %112 = vector.load %arg2[%c8, %c0_44] : memref<16x128xf32, #tpu.memory_space<vmem>>, vector<1x128xf32>
    %113 = vector.broadcast %112 : vector<1x128xf32> to vector<8x128xf32>
    %114 = arith.addf %111, %113 : vector<8x128xf32>
    %c0_45 = arith.constant 0 : index
    %c0_46 = arith.constant 0 : index
    %115 = vector.load %arg3[%c0_45, %c0_46] : memref<8x128xf32, #tpu.memory_space<vmem>>, vector<8x128xf32>
    tpu.vector_store %arg3[%c0_45, %c0_46], %114 {strides = array<i32>} : memref<8x128xf32, #tpu.memory_space<vmem>>, vector<8x128xf32>,
    return
  }
}

</mosaic_0001>

<bundles_post_ra>
// kernel: tpu_custom_call.1
= control target key start
LH: loop header
LB: loop body
LE: loop exit
PB: predicated region body
PF: predicated region fallthrough
CT: control target
= control target key end

     0   :  { %8 = vsyncpa [#allocation3], 0  ;;  %s1094_s0 = inlined_call_operand.hbm [shape: f32[8,32], index: 0, kind: input, shape index: {}]   ;;  %s1095_s1 = inlined_call_operand.hbm [shape: f32[544,128], index: 1, kind: input, shape index: {}]   ;;  %s1096_s2 = inlined_call_operand.hbm [shape: f32[16,128], index: 2, kind: input, shape index: {}]   ;;  %s1097_s3 = inlined_call_operand.hbm [shape: f32[8,128], index: 3, kind: output, shape index: {}]  }
   0x1   :  { %9 = vsyncpa [#allocation6], 0 }
   0x2   :  { %10 = vsyncpa [#allocation4], 0  ;;  %s966_s12 = smov [#allocation5]  }
   0x3   :  { %s26_s13 = sshll.u32 %s966_s12, 4  ;;  %s27_s13 = int_to_ptr.vmem [resolvable:$true] %s26_s13 }
   0x4   :  { %s888_s14 = scalar_lea.vmem %s27_s13, 8704  ;;  %p893_p1 = scmp.lt.s32.totalorder %s27_s13, %s27_s13 }
   0x5   :  { %p889_p0 = scmp.ne.s32.totalorder %s27_s13, %s888_s14  ;;  %p894_p2 = scmp.lt.s32.totalorder %s888_s14, %s888_s14 }
   0x7   :  { %p895_p3 = por %p894_p2, %p893_p1 }
   0x9   :  { %p896_p4 = pnand %p895_p3, %p889_p0 }
   0xb   :  { %899 = shalt.err (!%p896_p4)
}
   0xc   :  { %s967_s15 = smov 128   ;;  %s968_s16 = smov 8  }
   0xd   :  { %32 = dma.hbm_to_vmem [thread:$0]  %s1095_s1, 8704, %s27_s13, [#allocation6], %s967_s15, %s967_s15, %s968_s16  }
   0xe   :  { %s969_s19 = smov [#allocation2]   ;;  %s970_s21 = smov [#allocation7]  }
   0xf   :  { %s17_s20 = sshll.u32 %s969_s19, 4  ;;  %s38_s22 = sshll.u32 %s970_s21, 4  ;;  %s18_s20 = int_to_ptr.vmem [resolvable:$true] %s17_s20  ;;  %s39_s22 = int_to_ptr.vmem [resolvable:$true] %s38_s22 }
  0x10   :  { %s908_s23 = scalar_lea.vmem %s18_s20, 128  ;;  %p913_p6 = scmp.lt.s32.totalorder %s18_s20, %s18_s20 }
  0x11   :  { %p909_p5 = scmp.ne.s32.totalorder %s18_s20, %s908_s23  ;;  %p914_p7 = scmp.lt.s32.totalorder %s908_s23, %s908_s23 }
  0x13   :  { %p915_p8 = por %p914_p7, %p913_p6 }
  0x15   :  { %p916_p9 = pnand %p915_p8, %p909_p5 }
  0x17   :  { %919 = shalt.err (!%p916_p9)
}
  0x18   :  { %20 = dma.hbm_to_vmem [thread:$0]  %s1094_s0, 128, %s18_s20, [#allocation3]  }
  0x19   :  { %s928_s26 = scalar_lea.vmem %s39_s22, 256  ;;  %p933_p11 = scmp.lt.s32.totalorder %s39_s22, %s39_s22 }
  0x1a   :  { %p929_p10 = scmp.ne.s32.totalorder %s39_s22, %s928_s26  ;;  %p934_p12 = scmp.lt.s32.totalorder %s928_s26, %s928_s26 }
  0x1c   :  { %p935_p13 = por %p934_p12, %p933_p11 }
  0x1e   :  { %p936_p0 = pnand %p935_p13, %p929_p10 }
  0x20   :  { %939 = shalt.err (!%p936_p0)
}
  0x21   :  { %44 = dma.hbm_to_vmem [thread:$0]  %s1096_s2, 256, %s39_s22, [#allocation6], %s967_s15, %s967_s15, %s968_s16  }
  0x22   :  { %960 = dma.done.wait [#allocation3], 128  }
  0x23   :  { %961 = vsyncadd [#allocation3], 4294967168 }
  0x24   :  { %962 = dma.done.wait [#allocation6], 8960  }
  0x25   :  { %963 = vsyncadd [#allocation6], 4294958336  ;;  %v971_v0 = vmov 0.0   ;;  %vm972_vm0 = vmmov 0   ;;  %v58_v1 = vld [vmem:[#allocation5 + $0x18] sm:$0xff]  ;;  %v57_v2 = vld [vmem:[#allocation5 + $0x10] sm:$0xff]  ;;  %v157_v41 = vlaneseq }
  0x26   :  { %713 = vmatprep.subr.mxu0 %v971_v0  ;;  %721 = vmatprep.mubr.msk.f32.mxu0 %vm972_vm0, %v971_v0  ;;  %v56_v3 = vld [vmem:[#allocation5 + $0x8] sm:$0xff]  ;;  %v55_v4 = vld [vmem:[#allocation5] sm:$0xff]  ;;  %v54_v5 = vld [vmem:[#allocation2] sm:$0xff]  ;;  %vm59_vm1 = vcmask 261120   ;;  %s973_s0 = smov [#allocation8]  }
  0x27   :  { %724 = vmatprep.subr.mxu1 %v971_v0  ;;  %756 = vmatprep.mubr.msk.f32.mxu1 %vm972_vm0, %v971_v0  ;;  %v183_v6 = vld [vmem:[#allocation5 + $0x98] sm:$0xff]  ;;  %v182_v7 = vld [vmem:[#allocation5 + $0x90] sm:$0xff]  ;;  %v181_v8 = vld [vmem:[#allocation5 + $0x88] sm:$0xff]  ;;  %v158_v42 = vshrl.u32 %v157_v41, 7  ;;  %s628_s2 = sshll.u32 %s973_s0, 4  ;;  %s629_s2 = int_to_ptr.vmem [resolvable:$true] %s628_s2 }
  0x28   :  { %714 = vmatpush3.msra.mxu0 %v58_v1  ;;  %725 = vmatpush3.msra.mxu1 %v183_v6  ;;  %v180_v9 = vld [vmem:[#allocation5 + $0x80] sm:$0xff]  ;;  %v179_v10 = vld [vmem:[#allocation5 + $0x78] sm:$0xff]  ;;  %v178_v11 = vld [vmem:[#allocation5 + $0x70] sm:$0xff]  ;;  %s940_s28 = scalar_lea.vmem %s629_s2, 128  ;;  %p945_p2 = scmp.lt.s32.totalorder %s629_s2, %s629_s2 }
  0x29   :  { %715 = vmatprep.subr.mxu0 %v971_v0  ;;  %726 = vmatprep.subr.mxu1 %v971_v0  ;;  %v177_v12 = vld [vmem:[#allocation5 + $0x68] sm:$0xff]  ;;  %v176_v13 = vld [vmem:[#allocation5 + $0x60] sm:$0xff]  ;;  %v175_v14 = vld [vmem:[#allocation5 + $0x58] sm:$0xff]  ;;  %v1031_v44 = vsub.s32 0, %v158_v42  ;;  %p941_p1 = scmp.ne.s32.totalorder %s629_s2, %s940_s28  ;;  %p946_p3 = scmp.lt.s32.totalorder %s940_s28, %s940_s28 }
  0x2a   :  { %716 = vmatpush3.msra.mxu0 %v57_v2  ;;  %727 = vmatpush3.msra.mxu1 %v182_v7  ;;  %v174_v15 = vld [vmem:[#allocation5 + $0x50] sm:$0xff]  ;;  %v173_v16 = vld [vmem:[#allocation5 + $0x48] sm:$0xff]  ;;  %v172_v17 = vld [vmem:[#allocation5 + $0x40] sm:$0xff] }
  0x2b   :  { %717 = vmatprep.subr.mxu0 %v971_v0  ;;  %728 = vmatprep.subr.mxu1 %v971_v0  ;;  %v171_v18 = vld [vmem:[#allocation5 + $0x38] sm:$0xff]  ;;  %v170_v19 = vld [vmem:[#allocation5 + $0x30] sm:$0xff]  ;;  %v169_v20 = vld [vmem:[#allocation5 + $0x28] sm:$0xff]  ;;  %p947_p4 = por %p946_p3, %p945_p2 }
  0x2c   :  { %718 = vmatpush3.msra.mxu0 %v56_v3  ;;  %729 = vmatpush3.msra.mxu1 %v181_v8  ;;  %v168_v21 = vld [vmem:[#allocation5 + $0x20] sm:$0xff]  ;;  %v303_v55 = vld [vmem:[#allocation5 + $0x118] sm:$0xff]  ;;  %v302_v56 = vld [vmem:[#allocation5 + $0x110] sm:$0xff] }
  0x2d   :  { %719 = vmatprep.subr.mxu0 %v971_v0  ;;  %730 = vmatprep.subr.mxu1 %v971_v0  ;;  %v152_v43 = vld [vmem:[#allocation7] sm:$0x1]  ;;  %v154_v47 = vld [vmem:[#allocation7 + $0x4] sm:$0x1]  ;;  %v301_v57 = vld [vmem:[#allocation5 + $0x108] sm:$0xff]  ;;  %p948_p5 = pnand %p947_p4, %p941_p1 }
  0x2e   :  { %720 = vmatpush3.msra.mxu0 %v55_v4  ;;  %731 = vmatpush3.msra.mxu1 %v180_v9  ;;  %v300_v58 = vld [vmem:[#allocation5 + $0x100] sm:$0xff]  ;;  %v299_v59 = vld [vmem:[#allocation5 + $0xf8] sm:$0xff]  ;;  %v298_v60 = vld [vmem:[#allocation5 + $0xf0] sm:$0xff] }
  0x2f   :  { %722 = vmatmul.mubr.msk.f32.vlgmr.msra.gmra.mxu0 %vm59_vm1, %v54_v5  ;;  %759 = vmatprep.subr.mxu0 %v971_v0  ;;  %v297_v61 = vld [vmem:[#allocation5 + $0xe8] sm:$0xff]  ;;  %v296_v62 = vld [vmem:[#allocation5 + $0xe0] sm:$0xff]  ;;  %v295_v63 = vld [vmem:[#allocation5 + $0xd8] sm:$0xff] }
  0x30   :  { %791 = vmatprep.mubr.msk.f32.mxu0 %vm972_vm0, %v971_v0  ;;  %732 = vmatprep.subr.mxu1 %v971_v0  ;;  %v294_v1 = vld [vmem:[#allocation5 + $0xd0] sm:$0xff]  ;;  %v293_v2 = vld [vmem:[#allocation5 + $0xc8] sm:$0xff]  ;;  %v292_v3 = vld [vmem:[#allocation5 + $0xc0] sm:$0xff] }
  0x31   :  { %733 = vmatpush3.msra.mxu1 %v179_v10  ;;  %760 = vmatpush3.msra.mxu0 %v303_v55  ;;  %v291_v4 = vld [vmem:[#allocation5 + $0xb8] sm:$0xff]  ;;  %v290_v5 = vld [vmem:[#allocation5 + $0xb0] sm:$0xff]  ;;  %v289_v6 = vld [vmem:[#allocation5 + $0xa8] sm:$0xff] }
  0x32   :  { %734 = vmatprep.subr.mxu1 %v971_v0  ;;  %761 = vmatprep.subr.mxu0 %v971_v0  ;;  %v288_v7 = vld [vmem:[#allocation5 + $0xa0] sm:$0xff]  ;;  %v419_v42 = vld [vmem:[#allocation5 + $0x178] sm:$0xff] }
  0x33   :  { %735 = vmatpush3.msra.mxu1 %v178_v11  ;;  %762 = vmatpush3.msra.mxu0 %v302_v56  ;;  %v420_v41 = vld [vmem:[#allocation5 + $0x180] sm:$0xff] }
  0x34   :  { %736 = vmatprep.subr.mxu1 %v971_v0  ;;  %763 = vmatprep.subr.mxu0 %v971_v0 }
  0x35   :  { %737 = vmatpush3.msra.mxu1 %v177_v12  ;;  %764 = vmatpush3.msra.mxu0 %v301_v57 }
  0x36   :  { %738 = vmatprep.subr.mxu1 %v971_v0  ;;  %765 = vmatprep.subr.mxu0 %v971_v0 }
  0x37   :  { %739 = vmatpush3.msra.mxu1 %v176_v13  ;;  %766 = vmatpush3.msra.mxu0 %v300_v58 }
  0x38   :  { %740 = vmatprep.subr.mxu1 %v971_v0  ;;  %767 = vmatprep.subr.mxu0 %v971_v0 }
  0x39   :  { %741 = vmatpush3.msra.mxu1 %v175_v14  ;;  %768 = vmatpush3.msra.mxu0 %v299_v59 }
  0x3a   :  { %742 = vmatprep.subr.mxu1 %v971_v0  ;;  %769 = vmatprep.subr.mxu0 %v971_v0 }
  0x3b   :  { %743 = vmatpush3.msra.mxu1 %v174_v15  ;;  %770 = vmatpush3.msra.mxu0 %v298_v60 }
  0x3c   :  { %744 = vmatprep.subr.mxu1 %v971_v0  ;;  %771 = vmatprep.subr.mxu0 %v971_v0 }
  0x3d   :  { %745 = vmatpush3.msra.mxu1 %v173_v16  ;;  %772 = vmatpush3.msra.mxu0 %v297_v61 }
  0x3e   :  { %746 = vmatprep.subr.mxu1 %v971_v0  ;;  %773 = vmatprep.subr.mxu0 %v971_v0 }
  0x3f   :  { %747 = vmatpush3.msra.mxu1 %v172_v17  ;;  %774 = vmatpush3.msra.mxu0 %v296_v62 }
  0x40   :  { %748 = vmatprep.subr.mxu1 %v971_v0  ;;  %775 = vmatprep.subr.mxu0 %v971_v0 }
  0x41   :  { %749 = vmatpush3.msra.mxu1 %v171_v18  ;;  %776 = vmatpush3.msra.mxu0 %v295_v63 }
  0x42   :  { %750 = vmatprep.subr.mxu1 %v971_v0  ;;  %777 = vmatprep.subr.mxu0 %v971_v0 }
  0x43   :  { %751 = vmatpush3.msra.mxu1 %v170_v19  ;;  %778 = vmatpush3.msra.mxu0 %v294_v1 }
  0x44   :  { %752 = vmatprep.subr.mxu1 %v971_v0  ;;  %779 = vmatprep.subr.mxu0 %v971_v0 }
  0x45   :  { %753 = vmatpush3.msra.mxu1 %v169_v20  ;;  %780 = vmatpush3.msra.mxu0 %v293_v2 }
  0x46   :  { %754 = vmatprep.subr.mxu1 %v971_v0  ;;  %781 = vmatprep.subr.mxu0 %v971_v0 }
  0x47   :  { %755 = vmatpush3.msra.mxu1 %v168_v21  ;;  %782 = vmatpush3.msra.mxu0 %v292_v3 }
  0x48   :  { %794 = vmatprep.subr.mxu1 %v971_v0  ;;  %783 = vmatprep.subr.mxu0 %v971_v0 }
  0x49   :  { %784 = vmatpush3.msra.mxu0 %v291_v4 }
  0x4a   :  { %785 = vmatprep.subr.mxu0 %v971_v0 }
  0x4b   :  { %786 = vmatpush3.msra.mxu0 %v290_v5 }
  0x4c   :  { %787 = vmatprep.subr.mxu0 %v971_v0 }
  0x4d   :  { %788 = vmatpush3.msra.mxu0 %v289_v6 }
  0x4e   :  { %789 = vmatprep.subr.mxu0 %v971_v0 }
  0x4f   :  { %790 = vmatpush3.msra.mxu0 %v288_v7 }
  0x50   :  { %829 = vmatprep.subr.mxu0 %v971_v0 }
  0xef   :  { %v129_v22 = vpop.f32.mrf.mxu0 }
  0xf0   :  { %v133_v23 = vrot.slane %v129_v22, 4 }
  0xf1   :  { %v723_v24 = vpop.f32.mrf.mxu0 }
  0xf2   :  { %v134_v25 = vadd.f32 %v133_v23, %v129_v22 }
  0xf4   :  { %v135_v26 = vrot.slane %v134_v25, 2 }
  0xf6   :  { %v136_v27 = vadd.f32 %v135_v26, %v134_v25 }
  0xf8   :  { %v137_v28 = vrot.slane %v136_v27, 1 }
  0xfa   :  { %v138_v29 = vadd.f32 %v137_v28, %v136_v27  ;;  %v272_v27 = vld [vmem:[#allocation7 + $0x1] sm:$0x1] }
  0xfc   :  { %v140_v30 = vmul.f32 0.125, %v138_v29 }
  0xfe   :  { %v141_v31 = vsub.f32 %v129_v22, %v140_v30 }
 0x100   :  { %v142_v32 = vmul.f32 %v141_v31, %v141_v31 }
 0x102   :  { %v143_v33 = vrot.slane %v142_v32, 4 }
 0x104   :  { %v144_v34 = vadd.f32 %v143_v33, %v142_v32 }
 0x106   :  { %v145_v35 = vrot.slane %v144_v34, 2 }
 0x108   :  { %v146_v36 = vadd.f32 %v145_v35, %v144_v34 }
 0x10a   :  { %v147_v37 = vrot.slane %v146_v36, 1 }
 0x10c   :  { %v148_v38 = vadd.f32 %v147_v37, %v146_v36 }
 0x10e   :  { %v149_v39 = vmul.f32 0.125, %v148_v38  ;;  %v423_v38 = vld [vmem:[#allocation5 + $0x198] sm:$0xff] }
 0x110   :  { %v150_v40 = vadd.f32 1e-05, %v149_v39  ;;  %v422_v39 = vld [vmem:[#allocation5 + $0x190] sm:$0xff] }
 0x112   :  { %872 = vrsqrt.f32 %v150_v40  ;;  %v421_v40 = vld [vmem:[#allocation5 + $0x188] sm:$0xff] }
 0x11f   :  { %v873_v45 = vpop.eup %872 }
 0x120   :  { %v153_v46 = vmul.f32 %v873_v45, %v152_v43  ;;  %v418_v43 = vld [vmem:[#allocation5 + $0x170] sm:$0xff]  ;;  %v417_v45 = vld [vmem:[#allocation5 + $0x168] sm:$0xff] }
 0x122   :  { %v155_v48 = vmul.f32 %v153_v46, %v140_v30  ;;  %v160_v49 = vrot.slane %v153_v46, %v1031_v44  ;;  %v274_v30 = vld [vmem:[#allocation7 + $0x5] sm:$0x1] }
 0x123   :  { %v416_v46 = vld [vmem:[#allocation5 + $0x160] sm:$0xff] }
 0x124   :  { %v156_v50 = vsub.f32 %v154_v47, %v155_v48  ;;  %v161_v51 = vmul.f32 %v160_v49, %v129_v22  ;;  %v415_v47 = vld [vmem:[#allocation5 + $0x158] sm:$0xff]  ;;  %v414_v48 = vld [vmem:[#allocation5 + $0x150] sm:$0xff]  ;;  %v413_v49 = vld [vmem:[#allocation5 + $0x148] sm:$0xff] }
 0x126   :  { %v165_v52 = vrot.slane %v156_v50, %v1031_v44  ;;  %v412_v50 = vld [vmem:[#allocation5 + $0x140] sm:$0xff] }
 0x128   :  { %v166_v53 = vadd.f32 %v165_v52, %v161_v51  ;;  %v411_v51 = vld [vmem:[#allocation5 + $0x138] sm:$0xff]  ;;  %v410_v52 = vld [vmem:[#allocation5 + $0x130] sm:$0xff] }
 0x12a   :  { %v167_v54 = vmax.f32 %v166_v53, 0.0  ;;  %v409_v53 = vld [vmem:[#allocation5 + $0x128] sm:$0xff] }
 0x12c   :  { %757 = vmatmul.mubr.f32.vlgmr.msra.gmra.mxu1 %v167_v54  ;;  %v408_v54 = vld [vmem:[#allocation5 + $0x120] sm:$0xff] }
 0x12d   :  { %826 = vmatprep.mubr.msk.f32.mxu1 %vm972_vm0, %v971_v0  ;;  %795 = vmatpush3.msra.mxu1 %v423_v38 }
 0x12e   :  { %796 = vmatprep.subr.mxu1 %v971_v0 }
 0x12f   :  { %797 = vmatpush3.msra.mxu1 %v422_v39 }
 0x130   :  { %798 = vmatprep.subr.mxu1 %v971_v0 }
 0x131   :  { %799 = vmatpush3.msra.mxu1 %v421_v40 }
 0x132   :  { %800 = vmatprep.subr.mxu1 %v971_v0 }
 0x133   :  { %801 = vmatpush3.msra.mxu1 %v420_v41 }
 0x134   :  { %802 = vmatprep.subr.mxu1 %v971_v0 }
 0x135   :  { %803 = vmatpush3.msra.mxu1 %v419_v42 }
 0x136   :  { %804 = vmatprep.subr.mxu1 %v971_v0 }
 0x137   :  { %805 = vmatpush3.msra.mxu1 %v418_v43 }
 0x138   :  { %806 = vmatprep.subr.mxu1 %v971_v0 }
 0x139   :  { %807 = vmatpush3.msra.mxu1 %v417_v45 }
 0x13a   :  { %808 = vmatprep.subr.mxu1 %v971_v0 }
 0x13b   :  { %809 = vmatpush3.msra.mxu1 %v416_v46 }
 0x13c   :  { %810 = vmatprep.subr.mxu1 %v971_v0 }
 0x13d   :  { %811 = vmatpush3.msra.mxu1 %v415_v47 }
 0x13e   :  { %812 = vmatprep.subr.mxu1 %v971_v0 }
 0x13f   :  { %813 = vmatpush3.msra.mxu1 %v414_v48 }
 0x140   :  { %814 = vmatprep.subr.mxu1 %v971_v0 }
 0x141   :  { %815 = vmatpush3.msra.mxu1 %v413_v49 }
 0x142   :  { %816 = vmatprep.subr.mxu1 %v971_v0 }
 0x143   :  { %817 = vmatpush3.msra.mxu1 %v412_v50 }
 0x144   :  { %818 = vmatprep.subr.mxu1 %v971_v0 }
 0x145   :  { %819 = vmatpush3.msra.mxu1 %v411_v51 }
 0x146   :  { %820 = vmatprep.subr.mxu1 %v971_v0 }
 0x147   :  { %821 = vmatpush3.msra.mxu1 %v410_v52 }
 0x148   :  { %822 = vmatprep.subr.mxu1 %v971_v0 }
 0x149   :  { %823 = vmatpush3.msra.mxu1 %v409_v53 }
 0x14a   :  { %824 = vmatprep.subr.mxu1 %v971_v0 }
 0x14b   :  { %825 = vmatpush3.msra.mxu1 %v408_v54 }
 0x1ec   :  { %v250_v8 = vpop.f32.mrf.mxu1 }
 0x1ed   :  { %v254_v9 = vrot.slane %v250_v8, 4 }
 0x1ee   :  { %v758_v10 = vpop.f32.mrf.mxu1 }
 0x1ef   :  { %v255_v11 = vadd.f32 %v254_v9, %v250_v8 }
 0x1f1   :  { %v256_v12 = vrot.slane %v255_v11, 2 }
 0x1f3   :  { %v257_v13 = vadd.f32 %v256_v12, %v255_v11  ;;  %v392_v11 = vld [vmem:[#allocation7 + $0x2] sm:$0x1] }
 0x1f5   :  { %v258_v14 = vrot.slane %v257_v13, 1 }
 0x1f7   :  { %v259_v15 = vadd.f32 %v258_v14, %v257_v13  ;;  %v394_v14 = vld [vmem:[#allocation7 + $0x6] sm:$0x1] }
 0x1f9   :  { %v260_v16 = vmul.f32 0.125, %v259_v15 }
 0x1fb   :  { %v261_v17 = vsub.f32 %v250_v8, %v260_v16 }
 0x1fd   :  { %v262_v18 = vmul.f32 %v261_v17, %v261_v17 }
 0x1ff   :  { %v263_v19 = vrot.slane %v262_v18, 4 }
 0x201   :  { %v264_v20 = vadd.f32 %v263_v19, %v262_v18 }
 0x203   :  { %v265_v21 = vrot.slane %v264_v20, 2 }
 0x205   :  { %v266_v22 = vadd.f32 %v265_v21, %v264_v20 }
 0x207   :  { %v267_v23 = vrot.slane %v266_v22, 1 }
 0x209   :  { %v268_v24 = vadd.f32 %v267_v23, %v266_v22  ;;  %v543_v22 = vld [vmem:[#allocation5 + $0x218] sm:$0xff]  ;;  %v542_v23 = vld [vmem:[#allocation5 + $0x210] sm:$0xff] }
 0x20b   :  { %v269_v25 = vmul.f32 0.125, %v268_v24  ;;  %v541_v24 = vld [vmem:[#allocation5 + $0x208] sm:$0xff] }
 0x20d   :  { %v270_v26 = vadd.f32 1e-05, %v269_v25  ;;  %v540_v25 = vld [vmem:[#allocation5 + $0x200] sm:$0xff] }
 0x20f   :  { %874 = vrsqrt.f32 %v270_v26  ;;  %v539_v26 = vld [vmem:[#allocation5 + $0x1f8] sm:$0xff] }
 0x21c   :  { %v875_v28 = vpop.eup %874 }
 0x21d   :  { %v273_v29 = vmul.f32 %v875_v28, %v272_v27  ;;  %v538_v27 = vld [vmem:[#allocation5 + $0x1f0] sm:$0xff]  ;;  %v537_v28 = vld [vmem:[#allocation5 + $0x1e8] sm:$0xff] }
 0x21f   :  { %v275_v31 = vmul.f32 %v273_v29, %v260_v16  ;;  %v280_v32 = vrot.slane %v273_v29, %v1031_v44  ;;  %v536_v29 = vld [vmem:[#allocation5 + $0x1e0] sm:$0xff] }
 0x221   :  { %v276_v33 = vsub.f32 %v274_v30, %v275_v31  ;;  %v281_v34 = vmul.f32 %v280_v32, %v250_v8  ;;  %v535_v30 = vld [vmem:[#allocation5 + $0x1d8] sm:$0xff]  ;;  %v534_v31 = vld [vmem:[#allocation5 + $0x1d0] sm:$0xff]  ;;  %v533_v32 = vld [vmem:[#allocation5 + $0x1c8] sm:$0xff] }
 0x223   :  { %v285_v35 = vrot.slane %v276_v33, %v1031_v44  ;;  %v532_v33 = vld [vmem:[#allocation5 + $0x1c0] sm:$0xff] }
 0x225   :  { %v286_v36 = vadd.f32 %v285_v35, %v281_v34  ;;  %v531_v34 = vld [vmem:[#allocation5 + $0x1b8] sm:$0xff]  ;;  %v530_v35 = vld [vmem:[#allocation5 + $0x1b0] sm:$0xff] }
 0x227   :  { %v287_v37 = vmax.f32 %v286_v36, 0.0  ;;  %v529_v36 = vld [vmem:[#allocation5 + $0x1a8] sm:$0xff] }
 0x229   :  { %792 = vmatmul.mubr.f32.vlgmr.msra.gmra.mxu0 %v287_v37  ;;  %v528_v37 = vld [vmem:[#allocation5 + $0x1a0] sm:$0xff] }
 0x22a   :  { %861 = vmatprep.mubr.msk.f32.mxu0 %vm972_vm0, %v971_v0  ;;  %830 = vmatpush3.msra.mxu0 %v543_v22 }
 0x22b   :  { %831 = vmatprep.subr.mxu0 %v971_v0 }
 0x22c   :  { %832 = vmatpush3.msra.mxu0 %v542_v23 }
 0x22d   :  { %833 = vmatprep.subr.mxu0 %v971_v0 }
 0x22e   :  { %834 = vmatpush3.msra.mxu0 %v541_v24 }
 0x22f   :  { %835 = vmatprep.subr.mxu0 %v971_v0 }
 0x230   :  { %836 = vmatpush3.msra.mxu0 %v540_v25 }
 0x231   :  { %837 = vmatprep.subr.mxu0 %v971_v0 }
 0x232   :  { %838 = vmatpush3.msra.mxu0 %v539_v26 }
 0x233   :  { %839 = vmatprep.subr.mxu0 %v971_v0 }
 0x234   :  { %840 = vmatpush3.msra.mxu0 %v538_v27 }
 0x235   :  { %841 = vmatprep.subr.mxu0 %v971_v0 }
 0x236   :  { %842 = vmatpush3.msra.mxu0 %v537_v28 }
 0x237   :  { %843 = vmatprep.subr.mxu0 %v971_v0 }
 0x238   :  { %844 = vmatpush3.msra.mxu0 %v536_v29 }
 0x239   :  { %845 = vmatprep.subr.mxu0 %v971_v0 }
 0x23a   :  { %846 = vmatpush3.msra.mxu0 %v535_v30 }
 0x23b   :  { %847 = vmatprep.subr.mxu0 %v971_v0 }
 0x23c   :  { %848 = vmatpush3.msra.mxu0 %v534_v31 }
 0x23d   :  { %849 = vmatprep.subr.mxu0 %v971_v0 }
 0x23e   :  { %850 = vmatpush3.msra.mxu0 %v533_v32 }
 0x23f   :  { %851 = vmatprep.subr.mxu0 %v971_v0 }
 0x240   :  { %852 = vmatpush3.msra.mxu0 %v532_v33 }
 0x241   :  { %853 = vmatprep.subr.mxu0 %v971_v0 }
 0x242   :  { %854 = vmatpush3.msra.mxu0 %v531_v34 }
 0x243   :  { %855 = vmatprep.subr.mxu0 %v971_v0 }
 0x244   :  { %856 = vmatpush3.msra.mxu0 %v530_v35 }
 0x245   :  { %857 = vmatprep.subr.mxu0 %v971_v0 }
 0x246   :  { %858 = vmatpush3.msra.mxu0 %v529_v36 }
 0x247   :  { %859 = vmatprep.subr.mxu0 %v971_v0 }
 0x248   :  { %860 = vmatpush3.msra.mxu0 %v528_v37 }
 0x2e9   :  { %v370_v55 = vpop.f32.mrf.mxu0 }
 0x2ea   :  { %v374_v56 = vrot.slane %v370_v55, 4 }
 0x2eb   :  { %v793_v57 = vpop.f32.mrf.mxu0 }
 0x2ec   :  { %v375_v58 = vadd.f32 %v374_v56, %v370_v55  ;;  %v512_v57 = vld [vmem:[#allocation7 + $0x3] sm:$0x1] }
 0x2ee   :  { %v376_v59 = vrot.slane %v375_v58, 2 }
 0x2f0   :  { %v377_v60 = vadd.f32 %v376_v59, %v375_v58 }
 0x2f2   :  { %v378_v61 = vrot.slane %v377_v60, 1 }
 0x2f4   :  { %v379_v62 = vadd.f32 %v378_v61, %v377_v60  ;;  %v514_v60 = vld [vmem:[#allocation7 + $0x7] sm:$0x1] }
 0x2f6   :  { %v380_v63 = vmul.f32 0.125, %v379_v62 }
 0x2f8   :  { %v381_v1 = vsub.f32 %v370_v55, %v380_v63 }
 0x2fa   :  { %v382_v2 = vmul.f32 %v381_v1, %v381_v1 }
 0x2fc   :  { %v383_v3 = vrot.slane %v382_v2, 4 }
 0x2fe   :  { %v384_v4 = vadd.f32 %v383_v3, %v382_v2 }
 0x300   :  { %v385_v5 = vrot.slane %v384_v4, 2 }
 0x302   :  { %v386_v6 = vadd.f32 %v385_v5, %v384_v4 }
 0x304   :  { %v387_v7 = vrot.slane %v386_v6, 1 }
 0x306   :  { %v388_v8 = vadd.f32 %v387_v7, %v386_v6  ;;  %v639_v6 = vld [vmem:[#allocation7 + $0x8] ss:$0 sm:$0xff] }
 0x308   :  { %v389_v9 = vmul.f32 0.125, %v388_v8 }
 0x30a   :  { %v390_v10 = vadd.f32 1e-05, %v389_v9 }
 0x30c   :  { %876 = vrsqrt.f32 %v390_v10 }
 0x319   :  { %v877_v12 = vpop.eup %876 }
 0x31a   :  { %v393_v13 = vmul.f32 %v877_v12, %v392_v11 }
 0x31c   :  { %v395_v15 = vmul.f32 %v393_v13, %v380_v63  ;;  %v400_v16 = vrot.slane %v393_v13, %v1031_v44 }
 0x31e   :  { %v396_v17 = vsub.f32 %v394_v14, %v395_v15  ;;  %v401_v18 = vmul.f32 %v400_v16, %v370_v55 }
 0x320   :  { %v405_v19 = vrot.slane %v396_v17, %v1031_v44 }
 0x322   :  { %v406_v20 = vadd.f32 %v405_v19, %v401_v18 }
 0x324   :  { %v407_v21 = vmax.f32 %v406_v20, 0.0 }
 0x326   :  { %827 = vmatmul.mubr.f32.vlgmr.msra.gmra.mxu1 %v407_v21 }
 0x3e6   :  { %v490_v38 = vpop.f32.mrf.mxu1 }
 0x3e7   :  { %v494_v39 = vrot.slane %v490_v38, 4 }
 0x3e8   :  { %v828_v40 = vpop.f32.mrf.mxu1 }
 0x3e9   :  { %v495_v41 = vadd.f32 %v494_v39, %v490_v38 }
 0x3eb   :  { %v496_v42 = vrot.slane %v495_v41, 2 }
 0x3ed   :  { %v497_v43 = vadd.f32 %v496_v42, %v495_v41 }
 0x3ef   :  { %v498_v45 = vrot.slane %v497_v43, 1 }
 0x3f1   :  { %v499_v46 = vadd.f32 %v498_v45, %v497_v43 }
 0x3f3   :  { %v500_v47 = vmul.f32 0.125, %v499_v46 }
 0x3f5   :  { %v501_v48 = vsub.f32 %v490_v38, %v500_v47 }
 0x3f7   :  { %v502_v49 = vmul.f32 %v501_v48, %v501_v48 }
 0x3f9   :  { %v503_v50 = vrot.slane %v502_v49, 4 }
 0x3fb   :  { %v504_v51 = vadd.f32 %v503_v50, %v502_v49 }
 0x3fd   :  { %v505_v52 = vrot.slane %v504_v51, 2 }
 0x3ff   :  { %v506_v53 = vadd.f32 %v505_v52, %v504_v51 }
 0x401   :  { %v507_v54 = vrot.slane %v506_v53, 1 }
 0x403   :  { %v508_v55 = vadd.f32 %v507_v54, %v506_v53 }
 0x405   :  { %v509_v56 = vmul.f32 0.125, %v508_v55 }
 0x407   :  { %v510_v0 = vadd.f32 1e-05, %v509_v56 }
 0x409   :  { %878 = vrsqrt.f32 %v510_v0 }
 0x416   :  { %v879_v58 = vpop.eup %878 }
 0x417   :  { %v513_v59 = vmul.f32 %v879_v58, %v512_v57 }
 0x419   :  { %v515_v61 = vmul.f32 %v513_v59, %v500_v47  ;;  %v520_v62 = vrot.slane %v513_v59, %v1031_v44 }
 0x41b   :  { %v516_v63 = vsub.f32 %v514_v60, %v515_v61  ;;  %v521_v1 = vmul.f32 %v520_v62, %v490_v38 }
 0x41d   :  { %v525_v2 = vrot.slane %v516_v63, %v1031_v44 }
 0x41f   :  { %v526_v3 = vadd.f32 %v525_v2, %v521_v1 }
 0x421   :  { %v527_v4 = vmax.f32 %v526_v3, 0.0 }
 0x423   :  { %862 = vmatmul.mubr.f32.vlgmr.msra.gmra.mxu0 %v527_v4 }
 0x4e3   :  { %v610_v5 = vpop.f32.mrf.mxu0 }
 0x4e4   :  { %v614_v7 = vadd.f32 %v610_v5, %v527_v4 }
 0x4e5   :  { %v863_v8 = vpop.f32.mrf.mxu0 }
 0x4e6   :  { %v620_v9 = vadd.f32 %v639_v6, %v614_v7 }
 0x4e8   :  { %621 = vst [vmem:[#allocation8] sm:$0xff] %v620_v9 }
 0x4e9   :  { %951 = shalt.err (!%p948_p5)
}
 0x4ea   :  { %631 = dma.vmem_to_hbm [thread:$0]  %s629_s2, 128, %s1097_s3, [#allocation4]  }
 0x4eb   :  { %964 = dma.done.wait [#allocation4], 128  }
 0x4ec   :  { %965 = vsyncadd [#allocation4], 4294967168 }
 0x4ed   :  { %635 = vsyncpa [#allocation3], 1 }
 0x4ee   :  { %636 = vsyncpa [#allocation6], 1 }
 0x4ef   :  { %637 = vsyncpa [#allocation4], 1 }

</bundles_post_ra>
